<compile_context>
chip_gen: v6e
topology: v6e:2x2x1
jax: 0.10.0
libtpu: 0.0.40
codegen_flags: <defaults>
</compile_context>

<pallas_src>
import functools

import jax
import jax.numpy as jnp
from jax.experimental import pallas as pl
from jax.experimental.pallas import tpu as pltpu

_LANE = 128     # lane width: last-dim alignment target (dense stores / MXU)
_SUBLANE = 8    # sublane width: second-to-last-dim alignment target


def _round_up(v, m):
    return ((v + m - 1) // m) * m


def _fused_gcn_kernel(adj_ref, x_ref, *refs, reassoc):
    """Fused multi-layer dense-GCN forward.

    refs = (w0_t, b0, w1_t, b1, ..., w{L-1}_t, b{L-1}, out_ref)
      w_t : [in_pad, out_pad]  (pre-transposed nn.Linear weight, zero-padded)
      b   : [1, out_pad]       (zero-padded bias)
    reassoc[l] statically selects (adj @ h) @ W^T + rowsum(adj) * b instead of
    adj @ (h @ W^T + b) when the layer expands the feature dim.
    """
    o_ref = refs[-1]
    wb_refs = refs[:-1]
    num_layers = len(wb_refs) // 2

    adj = adj_ref[...]
    h = x_ref[...]

    # Hoisted once: only needed for re-associated layers (adj @ (1 b) term).
    adj_rowsum = None
    if any(reassoc):
        adj_rowsum = jnp.sum(adj, axis=1, keepdims=True)  # [N_pad, 1], XLU

    for l in range(num_layers):
        w_t = wb_refs[2 * l][...]      # [in_pad, out_pad]
        b = wb_refs[2 * l + 1][...]    # [1, out_pad]
        if reassoc[l]:
            # (adj @ h) @ W^T + (adj @ 1) b  ==  adj @ (h @ W^T + 1 b)
            agg = jnp.dot(adj, h, preferred_element_type=jnp.float32)
            h = jnp.dot(agg, w_t, preferred_element_type=jnp.float32)
            h = h + adj_rowsum * b
        else:
            hidden = jnp.dot(h, w_t, preferred_element_type=jnp.float32) + b
            h = jnp.dot(adj, hidden, preferred_element_type=jnp.float32)
        if l < num_layers - 1:
            h = jnp.maximum(h, 0.0)    # F.relu between layers (VPU)

    o_ref[...] = h.astype(o_ref.dtype)


def gcn_forward(params, x, adj):
    """GCN_dense.forward in eval mode as one fused Pallas kernel.

    params: list of (W [out, in], b [out]) per layer (nn.Linear convention).
    x:      [N, in_channels] node features.
    adj:    [N, N] dense adjacency.
    """
    n, in_dim = x.shape
    out_dim = params[-1][0].shape[0]

    dims = [in_dim] + [w.shape[0] for (w, _) in params]
    dims_pad = [_round_up(d, _LANE) for d in dims]
    n_pad = _round_up(n, _SUBLANE)

    # Zero-padding keeps the contraction exact: padded W rows/cols, bias
    # entries and adj rows/cols are all zero, so padded lanes stay zero.
    x_p = jnp.zeros((n_pad, dims_pad[0]), jnp.float32).at[:n, :in_dim].set(x)
    adj_p = jnp.zeros((n_pad, n_pad), jnp.float32).at[:n, :n].set(adj)

    wb_p = []
    reassoc = []
    for l, (w, b) in enumerate(params):
        f_in, f_out = dims[l], dims[l + 1]
        fi_p, fo_p = dims_pad[l], dims_pad[l + 1]
        # Pre-transpose on the host so the kernel consumes W^T directly
        # (no in-kernel XLU transpose).
        w_t = jnp.zeros((fi_p, fo_p), jnp.float32).at[:f_in, :f_out].set(w.T)
        b_p = jnp.zeros((1, fo_p), jnp.float32).at[:, :f_out].set(b[None, :])
        wb_p += [w_t, b_p]
        # Static association choice based on logical layer shape.
        reassoc.append(f_in < f_out)

    # VMEM footprint of all whole-array operands (inputs + output + live
    # intermediates).  Add generous headroom; small graphs stay tiny anyway.
    max_feat = max(dims_pad)
    vmem_bytes = 4 * (
        n_pad * n_pad                                   # adj
        + 3 * n_pad * max_feat                          # x / h / hidden
        + sum(a.size for a in wb_p)                     # weights + biases
        + n_pad * dims_pad[-1]                          # output
    )
    vmem_limit = min(max(2 * vmem_bytes, 16 * 1024 * 1024), 100 * 1024 * 1024)

    # FLOP estimate for XLA's scheduler (two matmuls per layer).
    flops = 0
    for l in range(len(params)):
        flops += 2 * n_pad * n_pad * dims_pad[l if reassoc[l] else l + 1]
        flops += 2 * n_pad * dims_pad[l] * dims_pad[l + 1]
    bytes_accessed = 4 * (adj_p.size + x_p.size + sum(a.size for a in wb_p)
                          + n_pad * dims_pad[-1])

    vmem_spec = pl.BlockSpec(memory_space=pltpu.MemorySpace.VMEM)
    kern = functools.partial(_fused_gcn_kernel, reassoc=tuple(reassoc))

    out_p = pl.pallas_call(
        kern,
        out_shape=jax.ShapeDtypeStruct((n_pad, dims_pad[-1]), jnp.float32),
        in_specs=[vmem_spec] * (2 + len(wb_p)),
        out_specs=vmem_spec,
        compiler_params=pltpu.CompilerParams(vmem_limit_bytes=vmem_limit),
        cost_estimate=pl.CostEstimate(
            flops=flops, transcendentals=0, bytes_accessed=bytes_accessed),
    )(adj_p, x_p, *wb_p)

    return out_p[:n, :out_dim]


def init_gcn_params(key, in_channels, hidden_channels, out_channels,
                    num_layers):
    """Deterministic nn.Linear-style init (uniform(-1/sqrt(fan_in), ...))."""
    dims = ([in_channels]
            + [hidden_channels] * (num_layers - 1)
            + [out_channels])
    params = []
    for i in range(num_layers):
        fan_in, fan_out = dims[i], dims[i + 1]
        key, kw, kb = jax.random.split(key, 3)
        bound = 1.0 / jnp.sqrt(fan_in)
        w = jax.random.uniform(kw, (fan_out, fan_in), jnp.float32,
                               -bound, bound)
        b = jax.random.uniform(kb, (fan_out,), jnp.float32, -bound, bound)
        params.append((w, b))
    return params


if __name__ == "__main__":
    key = jax.random.PRNGKey(0)

    # Small, module-consistent shapes: N nodes with feature matrix [N, C_in]
    # and dense adjacency [N, N].
    num_nodes = 8
    in_channels = 16
    hidden_channels = 32
    out_channels = 8
    num_layers = 3

    k_x, k_a, k_p = jax.random.split(key, 3)
    x = jax.random.normal(k_x, (num_nodes, in_channels), jnp.float32)
    adj_raw = jax.random.uniform(k_a, (num_nodes, num_nodes), jnp.float32)
    adj = (adj_raw + adj_raw.T) * 0.5  # symmetric dense adjacency

    params = init_gcn_params(k_p, in_channels, hidden_channels, out_channels,
                             num_layers)

    out = jax.jit(gcn_forward)(params, x, adj)
    out = jax.block_until_ready(out)
    assert out.shape == (num_nodes, out_channels)

    # Pure-JAX reference of the PyTorch forward (eval mode: dropouts identity).
    ref = x
    for i, (w, b) in enumerate(params):
        ref = adj @ (ref @ w.T + b)
        if i < len(params) - 1:
            ref = jnp.maximum(ref, 0.0)
    assert jnp.allclose(out, ref, atol=1e-4, rtol=1e-4), (
        float(jnp.max(jnp.abs(out - ref))))

    print("KERNEL_OK")
</pallas_src>

<mosaic_0001>
module attributes {stable_mosaic.version = 11 : i64} {
  func.func @_fused_gcn_kernel(%arg0: memref<8x8xf32, #tpu.memory_space<vmem>>, %arg1: memref<8x128xf32, #tpu.memory_space<vmem>>, %arg2: memref<128x128xf32, #tpu.memory_space<vmem>>, %arg3: memref<1x128xf32, #tpu.memory_space<vmem>>, %arg4: memref<128x128xf32, #tpu.memory_space<vmem>>, %arg5: memref<1x128xf32, #tpu.memory_space<vmem>>, %arg6: memref<128x128xf32, #tpu.memory_space<vmem>>, %arg7: memref<1x128xf32, #tpu.memory_space<vmem>>, %arg8: memref<8x128xf32, #tpu.memory_space<vmem>>) attributes {dimension_semantics = [], scalar_prefetch = 0 : i64, scratch_operands = 0 : i64, tpu.core_type = #tpu.core_type<tc>} {
    %c0 = arith.constant 0 : index
    %c0_0 = arith.constant 0 : index
    %0 = vector.load %arg0[%c0, %c0_0] : memref<8x8xf32, #tpu.memory_space<vmem>>, vector<8x8xf32>
    %c0_1 = arith.constant 0 : index
    %c0_2 = arith.constant 0 : index
    %1 = vector.load %arg1[%c0_1, %c0_2] : memref<8x128xf32, #tpu.memory_space<vmem>>, vector<8x128xf32>
    %cst = arith.constant dense<0.000000e+00> : vector<8xf32>
    %2 = vector.multi_reduction <add>, %0, %cst [1] : vector<8x8xf32> to vector<8xf32>
    %3 = vector.shape_cast %2 : vector<8xf32> to vector<8x1xf32>
    %c0_3 = arith.constant 0 : index
    %c0_4 = arith.constant 0 : index
    %4 = vector.load %arg2[%c0_3, %c0_4] : memref<128x128xf32, #tpu.memory_space<vmem>>, vector<128x128xf32>
    %c0_5 = arith.constant 0 : index
    %c0_6 = arith.constant 0 : index
    %5 = vector.load %arg3[%c0_5, %c0_6] : memref<1x128xf32, #tpu.memory_space<vmem>>, vector<1x128xf32>
    %cst_7 = arith.constant dense<0.000000e+00> : vector<8x128xf32>
    %6 = tpu.matmul %0, %1, %cst_7 {dimension_numbers = #tpu.dot_dimension_numbers<[1], [0], [0], [1], [0, 0, 1, 1], [], []>} : vector<8x8xf32>, vector<8x128xf32>, vector<8x128xf32> -> vector<8x128xf32>
    %cst_8 = arith.constant dense<0.000000e+00> : vector<8x128xf32>
    %7 = tpu.matmul %6, %4, %cst_8 {dimension_numbers = #tpu.dot_dimension_numbers<[1], [0], [0], [1], [0, 0, 1, 1], [], []>} : vector<8x128xf32>, vector<128x128xf32>, vector<8x128xf32> -> vector<8x128xf32>
    %8 = vector.broadcast %3 : vector<8x1xf32> to vector<8x128xf32>
    %9 = vector.broadcast %5 : vector<1x128xf32> to vector<8x128xf32>
    %10 = arith.mulf %8, %9 : vector<8x128xf32>
    %11 = arith.addf %7, %10 : vector<8x128xf32>
    %cst_9 = arith.constant 0.000000e+00 : f32
    %12 = vector.broadcast %cst_9 : f32 to vector<8x128xf32>
    %13 = arith.maximumf %11, %12 : vector<8x128xf32>
    %c0_10 = arith.constant 0 : index
    %c0_11 = arith.constant 0 : index
    %14 = vector.load %arg4[%c0_10, %c0_11] : memref<128x128xf32, #tpu.memory_space<vmem>>, vector<128x128xf32>
    %c0_12 = arith.constant 0 : index
    %c0_13 = arith.constant 0 : index
    %15 = vector.load %arg5[%c0_12, %c0_13] : memref<1x128xf32, #tpu.memory_space<vmem>>, vector<1x128xf32>
    %cst_14 = arith.constant dense<0.000000e+00> : vector<8x128xf32>
    %16 = tpu.matmul %13, %14, %cst_14 {dimension_numbers = #tpu.dot_dimension_numbers<[1], [0], [0], [1], [0, 0, 1, 1], [], []>} : vector<8x128xf32>, vector<128x128xf32>, vector<8x128xf32> -> vector<8x128xf32>
    %17 = vector.broadcast %15 : vector<1x128xf32> to vector<8x128xf32>
    %18 = arith.addf %16, %17 : vector<8x128xf32>
    %cst_15 = arith.constant dense<0.000000e+00> : vector<8x128xf32>
    %19 = tpu.matmul %0, %18, %cst_15 {dimension_numbers = #tpu.dot_dimension_numbers<[1], [0], [0], [1], [0, 0, 1, 1], [], []>} : vector<8x8xf32>, vector<8x128xf32>, vector<8x128xf32> -> vector<8x128xf32>
    %cst_16 = arith.constant 0.000000e+00 : f32
    %20 = vector.broadcast %cst_16 : f32 to vector<8x128xf32>
    %21 = arith.maximumf %19, %20 : vector<8x128xf32>
    %c0_17 = arith.constant 0 : index
    %c0_18 = arith.constant 0 : index
    %22 = vector.load %arg6[%c0_17, %c0_18] : memref<128x128xf32, #tpu.memory_space<vmem>>, vector<128x128xf32>
    %c0_19 = arith.constant 0 : index
    %c0_20 = arith.constant 0 : index
    %23 = vector.load %arg7[%c0_19, %c0_20] : memref<1x128xf32, #tpu.memory_space<vmem>>, vector<1x128xf32>
    %cst_21 = arith.constant dense<0.000000e+00> : vector<8x128xf32>
    %24 = tpu.matmul %21, %22, %cst_21 {dimension_numbers = #tpu.dot_dimension_numbers<[1], [0], [0], [1], [0, 0, 1, 1], [], []>} : vector<8x128xf32>, vector<128x128xf32>, vector<8x128xf32> -> vector<8x128xf32>
    %25 = vector.broadcast %23 : vector<1x128xf32> to vector<8x128xf32>
    %26 = arith.addf %24, %25 : vector<8x128xf32>
    %cst_22 = arith.constant dense<0.000000e+00> : vector<8x128xf32>
    %27 = tpu.matmul %0, %26, %cst_22 {dimension_numbers = #tpu.dot_dimension_numbers<[1], [0], [0], [1], [0, 0, 1, 1], [], []>} : vector<8x8xf32>, vector<8x128xf32>, vector<8x128xf32> -> vector<8x128xf32>
    %c0_23 = arith.constant 0 : index
    %c0_24 = arith.constant 0 : index
    %28 = vector.load %arg8[%c0_23, %c0_24] : memref<8x128xf32, #tpu.memory_space<vmem>>, vector<8x128xf32>
    tpu.vector_store %arg8[%c0_23, %c0_24], %27 {strides = array<i32>} : memref<8x128xf32, #tpu.memory_space<vmem>>, vector<8x128xf32>,
    return
  }
}

</mosaic_0001>

<bundles_post_ra>
// kernel: gcn_forward.1
= control target key start
LH: loop header
LB: loop body
LE: loop exit
PB: predicated region body
PF: predicated region fallthrough
CT: control target
= control target key end

     0   :  { %vm32_vm0 = vcmask 64512   ;;  %v754_v2 = vmov 0.0   ;;  %vm755_vm1 = vmmov 0   ;;  %s1037_s0 = inlined_call_operand.vmem [shape: f32[8,8], index: 0, kind: input, shape index: {}]   ;;  %s1038_s1 = inlined_call_operand.vmem [shape: f32[8,128], index: 1, kind: input, shape index: {}]   ;;  %s1039_s2 = inlined_call_operand.vmem [shape: f32[128,128], index: 2, kind: input, shape index: {}]   ;;  %s1040_s3 = inlined_call_operand.vmem [shape: f32[1,128], index: 3, kind: input, shape index: {}]   ;;  %s1041_s4 = inlined_call_operand.vmem [shape: f32[128,128], index: 4, kind: input, shape index: {}]   ;;  %s1042_s5 = inlined_call_operand.vmem [shape: f32[1,128], index: 5, kind: input, shape index: {}]   ;;  %s1043_s6 = inlined_call_operand.vmem [shape: f32[128,128], index: 6, kind: input, shape index: {}]   ;;  %s1044_s7 = inlined_call_operand.vmem [shape: f32[1,128], index: 7, kind: input, shape index: {}]   ;;  %s1045_s8 = inlined_call_operand.hbm [shape: f32[8,128], index: 8, kind: output, shape index: {}]  }
   0x1   :  { %v31_v0 = vld [vmem:[%s1038_s1] sm:$0xff]  ;;  %609 = vmatprep.subr.mxu1 %v754_v2  ;;  %611 = vmatprep.mubr.msk.f32.mxu1 %vm755_vm1, %v754_v2  ;;  %v51_v3 = vld [vmem:[%s1039_s2 + $0x78] sm:$0xff]  ;;  %v50_v4 = vld [vmem:[%s1039_s2 + $0x70] sm:$0xff] }
   0x2   :  { %v808_v1 = vld [vmem:[%s1037_s0] sm:$0xff]  ;;  %610 = vmatpush3.msra.mxu1 %v31_v0  ;;  %649 = vmatprep.subr.mxu0 %v754_v2  ;;  %v49_v5 = vld [vmem:[%s1039_s2 + $0x68] sm:$0xff] }
   0x3   :  { %612 = vmatmul.mubr.msk.f32.vlgmr.msra.gmra.mxu1 %vm32_vm0, %v808_v1  ;;  %614 = vmatprep.subr.mxu1 %v754_v2 }
   0x4   :  { %615 = vmatpush3.msra.mxu1 %v51_v3  ;;  %646 = vmatprep.mubr.msk.f32.mxu1 %vm755_vm1, %v754_v2 }
   0x5   :  { %616 = vmatprep.subr.mxu1 %v754_v2  ;;  %681 = vmatprep.mubr.msk.f32.mxu0 %vm755_vm1, %v754_v2 }
   0x6   :  { %13 = vsyncpa [#allocation3], 0  ;;  %617 = vmatpush3.msra.mxu1 %v50_v4  ;;  %v48_v6 = vld [vmem:[%s1039_s2 + $0x60] sm:$0xff]  ;;  %v47_v7 = vld [vmem:[%s1039_s2 + $0x58] sm:$0xff]  ;;  %v33_v19 = vsel %vm32_vm0, %v808_v1, 0.0  ;;  %s756_s29 = smov [#allocation2]  }
   0x7   :  { %618 = vmatprep.subr.mxu1 %v754_v2  ;;  %v46_v8 = vld [vmem:[%s1039_s2 + $0x50] sm:$0xff]  ;;  %v45_v9 = vld [vmem:[%s1039_s2 + $0x48] sm:$0xff]  ;;  %v44_v10 = vld [vmem:[%s1039_s2 + $0x40] sm:$0xff]  ;;  %34 = vadd.xlane.f32.xlu0 %v33_v19  ;;  %s538_s30 = sshll.u32 %s756_s29, 4  ;;  %s539_s30 = int_to_ptr.vmem [resolvable:$true] %s538_s30 }
   0x8   :  { %619 = vmatpush3.msra.mxu1 %v49_v5  ;;  %v43_v11 = vld [vmem:[%s1039_s2 + $0x38] sm:$0xff]  ;;  %v42_v12 = vld [vmem:[%s1039_s2 + $0x30] sm:$0xff]  ;;  %v41_v13 = vld [vmem:[%s1039_s2 + $0x28] sm:$0xff]  ;;  %p737_p1 = scmp.lt.s32.totalorder %s539_s30, %s539_s30 }
   0x9   :  { %620 = vmatprep.subr.mxu1 %v754_v2  ;;  %v40_v14 = vld [vmem:[%s1039_s2 + $0x20] sm:$0xff]  ;;  %v39_v15 = vld [vmem:[%s1039_s2 + $0x18] sm:$0xff]  ;;  %v38_v16 = vld [vmem:[%s1039_s2 + $0x10] sm:$0xff] }
   0xa   :  { %621 = vmatpush3.msra.mxu1 %v48_v6  ;;  %v37_v17 = vld [vmem:[%s1039_s2 + $0x8] sm:$0xff]  ;;  %v36_v18 = vld [vmem:[%s1039_s2] sm:$0xff]  ;;  %v219_v20 = vld [vmem:[%s1041_s4 + $0x78] sm:$0xff] }
   0xb   :  { %622 = vmatprep.subr.mxu1 %v754_v2  ;;  %v218_v21 = vld [vmem:[%s1041_s4 + $0x70] sm:$0xff]  ;;  %650 = vmatpush3.msra.mxu0 %v219_v20  ;;  %v217_v22 = vld [vmem:[%s1041_s4 + $0x68] sm:$0xff]  ;;  %v216_v23 = vld [vmem:[%s1041_s4 + $0x60] sm:$0xff] }
   0xc   :  { %623 = vmatpush3.msra.mxu1 %v47_v7  ;;  %651 = vmatprep.subr.mxu0 %v754_v2  ;;  %v215_v24 = vld [vmem:[%s1041_s4 + $0x58] sm:$0xff]  ;;  %v214_v25 = vld [vmem:[%s1041_s4 + $0x50] sm:$0xff]  ;;  %v213_v26 = vld [vmem:[%s1041_s4 + $0x48] sm:$0xff] }
   0xd   :  { %624 = vmatprep.subr.mxu1 %v754_v2  ;;  %652 = vmatpush3.msra.mxu0 %v218_v21  ;;  %v212_v27 = vld [vmem:[%s1041_s4 + $0x40] sm:$0xff]  ;;  %v211_v28 = vld [vmem:[%s1041_s4 + $0x38] sm:$0xff]  ;;  %v210_v29 = vld [vmem:[%s1041_s4 + $0x30] sm:$0xff] }
   0xe   :  { %625 = vmatpush3.msra.mxu1 %v46_v8  ;;  %653 = vmatprep.subr.mxu0 %v754_v2  ;;  %v209_v30 = vld [vmem:[%s1041_s4 + $0x28] sm:$0xff]  ;;  %v208_v31 = vld [vmem:[%s1041_s4 + $0x20] sm:$0xff]  ;;  %v207_v32 = vld [vmem:[%s1041_s4 + $0x18] sm:$0xff] }
   0xf   :  { %626 = vmatprep.subr.mxu1 %v754_v2  ;;  %654 = vmatpush3.msra.mxu0 %v217_v22  ;;  %v206_v35 = vld [vmem:[%s1041_s4 + $0x10] sm:$0xff]  ;;  %v205_v36 = vld [vmem:[%s1041_s4 + $0x8] sm:$0xff]  ;;  %v204_v37 = vld [vmem:[%s1041_s4] sm:$0xff] }
  0x10   :  { %627 = vmatpush3.msra.mxu1 %v45_v9  ;;  %655 = vmatprep.subr.mxu0 %v754_v2  ;;  %v547_v39 = vld [vmem:[%s1040_s3] ss:$0 sm:$0xff]  ;;  %v383_v45 = vld [vmem:[%s1043_s6 + $0x78] sm:$0xff]  ;;  %v382_v46 = vld [vmem:[%s1043_s6 + $0x70] sm:$0xff] }
  0x11   :  { %628 = vmatprep.subr.mxu1 %v754_v2  ;;  %656 = vmatpush3.msra.mxu0 %v216_v23  ;;  %v381_v47 = vld [vmem:[%s1043_s6 + $0x68] sm:$0xff]  ;;  %v380_v48 = vld [vmem:[%s1043_s6 + $0x60] sm:$0xff]  ;;  %v379_v49 = vld [vmem:[%s1043_s6 + $0x58] sm:$0xff] }
  0x12   :  { %629 = vmatpush3.msra.mxu1 %v44_v10  ;;  %657 = vmatprep.subr.mxu0 %v754_v2  ;;  %v378_v50 = vld [vmem:[%s1043_s6 + $0x50] sm:$0xff]  ;;  %v377_v51 = vld [vmem:[%s1043_s6 + $0x48] sm:$0xff]  ;;  %v376_v52 = vld [vmem:[%s1043_s6 + $0x40] sm:$0xff] }
  0x13   :  { %630 = vmatprep.subr.mxu1 %v754_v2  ;;  %658 = vmatpush3.msra.mxu0 %v215_v24  ;;  %v375_v53 = vld [vmem:[%s1043_s6 + $0x38] sm:$0xff]  ;;  %v374_v54 = vld [vmem:[%s1043_s6 + $0x30] sm:$0xff]  ;;  %v373_v55 = vld [vmem:[%s1043_s6 + $0x28] sm:$0xff] }
  0x14   :  { %631 = vmatpush3.msra.mxu1 %v43_v11  ;;  %659 = vmatprep.subr.mxu0 %v754_v2  ;;  %v372_v56 = vld [vmem:[%s1043_s6 + $0x20] sm:$0xff]  ;;  %v371_v57 = vld [vmem:[%s1043_s6 + $0x18] sm:$0xff]  ;;  %v370_v58 = vld [vmem:[%s1043_s6 + $0x10] sm:$0xff] }
  0x15   :  { %632 = vmatprep.subr.mxu1 %v754_v2  ;;  %660 = vmatpush3.msra.mxu0 %v214_v25  ;;  %v548_v59 = vld [vmem:[%s1042_s5] ss:$0 sm:$0xff]  ;;  %v369_v63 = vld [vmem:[%s1043_s6 + $0x8] sm:$0xff] }
  0x16   :  { %633 = vmatpush3.msra.mxu1 %v42_v12  ;;  %661 = vmatprep.subr.mxu0 %v754_v2  ;;  %v368_v0 = vld [vmem:[%s1043_s6] sm:$0xff]  ;;  %s732_s6 = scalar_lea.vmem %s539_s30, 128 }
  0x17   :  { %634 = vmatprep.subr.mxu1 %v754_v2  ;;  %662 = vmatpush3.msra.mxu0 %v213_v26  ;;  %v550_v6 = vld [vmem:[%s1044_s7] ss:$0 sm:$0xff]  ;;  %p733_p0 = scmp.ne.s32.totalorder %s539_s30, %s732_s6  ;;  %p738_p2 = scmp.lt.s32.totalorder %s732_s6, %s732_s6 }
  0x18   :  { %635 = vmatpush3.msra.mxu1 %v41_v13  ;;  %663 = vmatprep.subr.mxu0 %v754_v2 }
  0x19   :  { %636 = vmatprep.subr.mxu1 %v754_v2  ;;  %664 = vmatpush3.msra.mxu0 %v212_v27  ;;  %p739_p3 = por %p738_p2, %p737_p1 }
  0x1a   :  { %637 = vmatpush3.msra.mxu1 %v40_v14  ;;  %665 = vmatprep.subr.mxu0 %v754_v2 }
  0x1b   :  { %638 = vmatprep.subr.mxu1 %v754_v2  ;;  %666 = vmatpush3.msra.mxu0 %v211_v28  ;;  %p740_p4 = pnand %p739_p3, %p733_p0 }
  0x1c   :  { %639 = vmatpush3.msra.mxu1 %v39_v15  ;;  %667 = vmatprep.subr.mxu0 %v754_v2 }
  0x1d   :  { %640 = vmatprep.subr.mxu1 %v754_v2  ;;  %668 = vmatpush3.msra.mxu0 %v210_v29 }
  0x1e   :  { %641 = vmatpush3.msra.mxu1 %v38_v16  ;;  %669 = vmatprep.subr.mxu0 %v754_v2 }
  0x1f   :  { %642 = vmatprep.subr.mxu1 %v754_v2  ;;  %670 = vmatpush3.msra.mxu0 %v209_v30 }
  0x20   :  { %643 = vmatpush3.msra.mxu1 %v37_v17  ;;  %671 = vmatprep.subr.mxu0 %v754_v2 }
  0x21   :  { %644 = vmatprep.subr.mxu1 %v754_v2  ;;  %672 = vmatpush3.msra.mxu0 %v208_v31 }
  0x22   :  { %645 = vmatpush3.msra.mxu1 %v36_v18  ;;  %673 = vmatprep.subr.mxu0 %v754_v2 }
  0x23   :  { %684 = vmatprep.subr.mxu1 %v754_v2  ;;  %674 = vmatpush3.msra.mxu0 %v207_v32 }
  0x24   :  { %675 = vmatprep.subr.mxu0 %v754_v2 }
  0x25   :  { %676 = vmatpush3.msra.mxu0 %v206_v35 }
  0x26   :  { %677 = vmatprep.subr.mxu0 %v754_v2 }
  0x27   :  { %678 = vmatpush3.msra.mxu0 %v205_v36 }
  0x28   :  { %679 = vmatprep.subr.mxu0 %v754_v2 }
  0x29   :  { %680 = vmatpush3.msra.mxu0 %v204_v37 }
  0x2a   :  { %689 = vmatprep.subr.mxu0 %v754_v2 }
  0x90   :  { %v35_v38 = vpop.xlane.xlu0 %34 }
  0x91   :  { %v132_v40 = vmul.f32 %v547_v39, %v35_v38 }
  0xc3   :  { %v122_v33 = vpop.f32.mrf.mxu1 }
  0xc4   :  { %647 = vmatmul.mubr.f32.vlgmr.msra.gmra.mxu1 %v122_v33 }
  0xc5   :  { %v613_v34 = vpop.f32.mrf.mxu1  ;;  %686 = vmatprep.mubr.msk.f32.mxu1 %vm755_vm1, %v754_v2 }
 0x184   :  { %v199_v41 = vpop.f32.mrf.mxu1 }
 0x185   :  { %v200_v42 = vadd.f32 %v199_v41, %v132_v40 }
 0x186   :  { %v648_v43 = vpop.f32.mrf.mxu1 }
 0x187   :  { %v203_v44 = vmax.f32 %v200_v42, 0.0 }
 0x189   :  { %682 = vmatmul.mubr.f32.vlgmr.msra.gmra.mxu0 %v203_v44 }
 0x18a   :  { %721 = vmatprep.mubr.msk.f32.mxu0 %vm755_vm1, %v754_v2  ;;  %690 = vmatpush3.msra.mxu0 %v383_v45 }
 0x18b   :  { %691 = vmatprep.subr.mxu0 %v754_v2 }
 0x18c   :  { %692 = vmatpush3.msra.mxu0 %v382_v46 }
 0x18d   :  { %693 = vmatprep.subr.mxu0 %v754_v2 }
 0x18e   :  { %694 = vmatpush3.msra.mxu0 %v381_v47 }
 0x18f   :  { %695 = vmatprep.subr.mxu0 %v754_v2 }
 0x190   :  { %696 = vmatpush3.msra.mxu0 %v380_v48 }
 0x191   :  { %697 = vmatprep.subr.mxu0 %v754_v2 }
 0x192   :  { %698 = vmatpush3.msra.mxu0 %v379_v49 }
 0x193   :  { %699 = vmatprep.subr.mxu0 %v754_v2 }
 0x194   :  { %700 = vmatpush3.msra.mxu0 %v378_v50 }
 0x195   :  { %701 = vmatprep.subr.mxu0 %v754_v2 }
 0x196   :  { %702 = vmatpush3.msra.mxu0 %v377_v51 }
 0x197   :  { %703 = vmatprep.subr.mxu0 %v754_v2 }
 0x198   :  { %704 = vmatpush3.msra.mxu0 %v376_v52 }
 0x199   :  { %705 = vmatprep.subr.mxu0 %v754_v2 }
 0x19a   :  { %706 = vmatpush3.msra.mxu0 %v375_v53 }
 0x19b   :  { %707 = vmatprep.subr.mxu0 %v754_v2 }
 0x19c   :  { %708 = vmatpush3.msra.mxu0 %v374_v54 }
 0x19d   :  { %709 = vmatprep.subr.mxu0 %v754_v2 }
 0x19e   :  { %710 = vmatpush3.msra.mxu0 %v373_v55 }
 0x19f   :  { %711 = vmatprep.subr.mxu0 %v754_v2 }
 0x1a0   :  { %712 = vmatpush3.msra.mxu0 %v372_v56 }
 0x1a1   :  { %713 = vmatprep.subr.mxu0 %v754_v2 }
 0x1a2   :  { %714 = vmatpush3.msra.mxu0 %v371_v57 }
 0x1a3   :  { %715 = vmatprep.subr.mxu0 %v754_v2 }
 0x1a4   :  { %716 = vmatpush3.msra.mxu0 %v370_v58 }
 0x1a5   :  { %717 = vmatprep.subr.mxu0 %v754_v2 }
 0x1a6   :  { %718 = vmatpush3.msra.mxu0 %v369_v63 }
 0x1a7   :  { %719 = vmatprep.subr.mxu0 %v754_v2 }
 0x1a8   :  { %720 = vmatpush3.msra.mxu0 %v368_v0 }
 0x249   :  { %v293_v60 = vpop.f32.mrf.mxu0 }
 0x24a   :  { %v294_v61 = vadd.f32 %v548_v59, %v293_v60 }
 0x24b   :  { %v683_v62 = vpop.f32.mrf.mxu0 }
 0x24c   :  { %685 = vmatpush3.msra.mxu1 %v294_v61 }
 0x24d   :  { %687 = vmatmul.mubr.msk.f32.vlgmr.msra.gmra.mxu1 %vm32_vm0, %v808_v1  ;;  %724 = vmatprep.subr.mxu1 %v754_v2 }
 0x24e   :  { %726 = vmatprep.mubr.msk.f32.mxu1 %vm755_vm1, %v754_v2 }
 0x30d   :  { %v363_v3 = vpop.f32.mrf.mxu1 }
 0x30e   :  { %v367_v4 = vmax.f32 %v363_v3, 0.0 }
 0x30f   :  { %v688_v5 = vpop.f32.mrf.mxu1 }
 0x310   :  { %722 = vmatmul.mubr.f32.vlgmr.msra.gmra.mxu0 %v367_v4 }
 0x3d0   :  { %v457_v7 = vpop.f32.mrf.mxu0 }
 0x3d1   :  { %v458_v8 = vadd.f32 %v550_v6, %v457_v7 }
 0x3d2   :  { %v723_v9 = vpop.f32.mrf.mxu0 }
 0x3d3   :  { %725 = vmatpush3.msra.mxu1 %v458_v8 }
 0x3d4   :  { %727 = vmatmul.mubr.msk.f32.vlgmr.msra.gmra.mxu1 %vm32_vm0, %v808_v1 }
 0x494   :  { %v527_v2 = vpop.f32.mrf.mxu1 }
 0x495   :  { %531 = vst [vmem:[#allocation2] sm:$0xff] %v527_v2 }
 0x496   :  { %v728_v10 = vpop.f32.mrf.mxu1 }
 0x497   :  { %743 = shalt.err (!%p740_p4)
}
 0x498   :  { %541 = dma.vmem_to_hbm [thread:$0]  %s539_s30, 128, %s1045_s8, [#allocation3]  }
 0x499   :  { %752 = dma.done.wait [#allocation3], 128  }
 0x49a   :  { %753 = vsyncadd [#allocation3], 4294967168 }
 0x49b   :  { %545 = vsyncpa [#allocation3], 1 }

</bundles_post_ra>
